<compile_context>
chip_gen: v5e
topology: v5e:2x2
jax: 0.10.0
libtpu: 0.0.40
codegen_flags: <defaults>
</compile_context>

<pallas_src>
import functools

import jax
import jax.numpy as jnp
import numpy as np
from jax.experimental import pallas as pl
from jax.experimental.pallas import tpu as pltpu

_RESIDENT_W_LIMIT = 8 << 20       # keep a fully-resident W below this (v7x VMEM)
_SINGLE_BUFFER_MIN = 1 << 20      # only bother single-buffering W/bias above this
_DEFAULT_TILE_N = 512             # N tile when W must be split (multiple of 128)


def _round_up(x: int, m: int) -> int:
    return (x + m - 1) // m * m


def _vmem_tile_bytes(rows: int, cols: int, itemsize: int) -> int:
    """VMEM footprint of one (rows, cols) block after (8,128) layout padding."""
    return _round_up(max(rows, 1), 8) * _round_up(max(cols, 1), 128) * itemsize


def _apply_act(x, act: str):
    if act == "silu":
        return x * jax.nn.sigmoid(x)        # sigmoid -> EUP, mul -> VPU
    if act == "relu":
        return jnp.maximum(x, 0.0)
    if act == "gelu":                        # exact erf form (torch nn.GELU default)
        return jax.nn.gelu(x, approximate=False)
    if act == "gelu_tanh":
        return jax.nn.gelu(x, approximate=True)
    if act == "tanh":
        return jnp.tanh(x)
    if act == "sigmoid":
        return jax.nn.sigmoid(x)
    if act == "identity":
        return x
    raise ValueError(f"unsupported act: {act}")


def _make_time_emb_kernel(act: str, compute_dtype):
    """kernel(t_ref, w_ref, b_ref, o_ref): o = act(t) @ W + b (f32 accumulation)."""
    cd = None if compute_dtype is None else jnp.dtype(compute_dtype)

    def kernel(t_ref, w_ref, b_ref, o_ref):
        a = _apply_act(t_ref[...].astype(jnp.float32), act)     # (TILE_B, IN)
        w = w_ref[...]                                           # (IN, TILE_N)
        if cd is not None:
            a = a.astype(cd)
            w = w.astype(cd)
        elif w.dtype != jnp.float32:
            w = w.astype(jnp.float32)
        out = jnp.dot(a, w, preferred_element_type=jnp.float32)  # MXU, f32 acc
        out = out + b_ref[...].astype(jnp.float32)               # (1, TILE_N) bcast
        o_ref[...] = out.astype(o_ref.dtype)

    return kernel


@functools.partial(jax.jit,
                   static_argnames=("act", "tile_b", "tile_n", "compute_dtype"))
def time_emb_forward(t, w, b, *, act: str = "silu", tile_b: int | None = None,
                     tile_n: int | None = None, compute_dtype=None):
    """TimeEmb forward.

    t: (B, in_dim), w: (in_dim, out_dim) [transposed vs torch's (out,in)],
    b: (out_dim,).  compute_dtype="bfloat16" optionally runs the MXU operands
    in bf16 (f32 accumulation kept) for higher throughput / half the W DMA.
    """
    B, in_dim = t.shape
    in_dim_w, out_dim = w.shape
    assert in_dim_w == in_dim, (in_dim_w, in_dim)
    assert b.shape == (out_dim,), b.shape

    w_item = jnp.dtype(w.dtype).itemsize
    t_item = jnp.dtype(t.dtype).itemsize
    out_dtype = jnp.result_type(t.dtype, w.dtype)

    # ---- batch tiling: >=2 grid steps when B > 8 (v7x megacore), cap 512 ----
    if tile_b is None:
        tile_b = B if B <= 8 else max(8, min(512, _round_up(-(-B // 2), 8)))
    else:
        tile_b = max(8, _round_up(int(tile_b), 8))
    if tile_b >= B:
        tile_b = B                       # block dim == full dim is always legal

    # ---- N tiling: only when a fully-resident W would be too big for VMEM ----
    resident_w_bytes = _vmem_tile_bytes(in_dim, out_dim, w_item)
    if tile_n is None:
        tile_n = out_dim if resident_w_bytes <= _RESIDENT_W_LIMIT else _DEFAULT_TILE_N
    tile_n = int(tile_n)
    if tile_n >= out_dim:
        tile_n = out_dim
    else:
        tile_n = max(128, _round_up(tile_n, 128))
        if tile_n >= out_dim:
            tile_n = out_dim

    nb = pl.cdiv(B, tile_b)
    nn = pl.cdiv(out_dim, tile_n)

    # ---- single-buffer resident W / bias (constant index map across grid) ----
    w_block_bytes = _vmem_tile_bytes(in_dim, tile_n, w_item)
    single_buf = (tile_n == out_dim) and (w_block_bytes >= _SINGLE_BUFFER_MIN)
    resident_kwargs = dict(pipeline_mode=pl.Buffered(1)) if single_buf else {}
    w_bufs = 1 if single_buf else 2

    # ---- VMEM budget from actual block footprints (48 MiB safe on v7x) ----
    vmem_est = (2 * _vmem_tile_bytes(tile_b, in_dim, t_item)        # t (dbl-buf)
                + 2 * _vmem_tile_bytes(tile_b, tile_n, 4)           # out (dbl-buf)
                + w_bufs * w_block_bytes                            # W
                + w_bufs * _vmem_tile_bytes(1, tile_n, w_item))     # bias
    vmem_limit = int(min(max(2 * vmem_est, 16 << 20), 48 << 20))

    # ---- cost estimate so XLA schedules around this (tiny) custom call ----
    transcendental_acts = ("silu", "gelu", "gelu_tanh", "tanh", "sigmoid")
    cost = pl.CostEstimate(
        flops=2 * B * in_dim * out_dim + 4 * B * in_dim,
        transcendentals=B * in_dim if act in transcendental_acts else 0,
        bytes_accessed=(B * in_dim * t_item + in_dim * out_dim * w_item
                        + out_dim * w_item
                        + B * out_dim * jnp.dtype(out_dtype).itemsize),
    )

    kernel = _make_time_emb_kernel(act, compute_dtype)

    out = pl.pallas_call(
        kernel,
        out_shape=jax.ShapeDtypeStruct((B, out_dim), out_dtype),
        grid=(nb, nn),
        in_specs=[
            pl.BlockSpec((tile_b, in_dim), lambda i, j: (i, 0)),            # t tile
            pl.BlockSpec((in_dim, tile_n), lambda i, j: (0, j),
                         **resident_kwargs),                                # W
            pl.BlockSpec((1, tile_n), lambda i, j: (0, j),
                         **resident_kwargs),                                # bias
        ],
        out_specs=pl.BlockSpec((tile_b, tile_n), lambda i, j: (i, j)),
        compiler_params=pltpu.CompilerParams(
            dimension_semantics=("parallel", "parallel"),
            vmem_limit_bytes=vmem_limit,
        ),
        cost_estimate=cost,
    )(t, w, b.reshape(1, out_dim))

    return out


def init_linear_params(key, in_dim, out_dim):
    """torch.nn.Linear default init (uniform +-1/sqrt(fan_in)); W stored (in, out)."""
    kw, kb = jax.random.split(key)
    bound = 1.0 / float(np.sqrt(in_dim))
    w = jax.random.uniform(kw, (in_dim, out_dim), jnp.float32, -bound, bound)
    b = jax.random.uniform(kb, (out_dim,), jnp.float32, -bound, bound)
    return w, b


def reference_forward(t, w, b, act: str = "silu"):
    """Pure-JAX reference: act(t) @ W + b."""
    return _apply_act(t.astype(jnp.float32), act) @ w + b


if __name__ == "__main__":
    # Small shapes consistent with the module: t is (batch, in_dim); the
    # linear maps in_dim -> out_dim.  Default act for diffusion time
    # embeddings is SiLU.
    batch = 8
    in_dim = 32
    out_dim = 64
    act = "silu"

    key = jax.random.PRNGKey(0)
    kt, kp = jax.random.split(key)

    t = jax.random.normal(kt, (batch, in_dim), jnp.float32)
    w, b = init_linear_params(kp, in_dim, out_dim)

    out = time_emb_forward(t, w, b, act=act)
    out = jax.block_until_ready(out)

    ref = reference_forward(t, w, b, act=act)
    np.testing.assert_allclose(np.asarray(out), np.asarray(ref),
                               rtol=1e-5, atol=1e-5)

    print("KERNEL_OK")
</pallas_src>

<mosaic_0001>
module attributes {stable_mosaic.version = 11 : i64} {
  func.func @kernel(%arg0: i32, %arg1: i32, %arg2: memref<8x32xf32, #tpu.memory_space<vmem>>, %arg3: memref<32x64xf32, #tpu.memory_space<vmem>>, %arg4: memref<1x64xf32, #tpu.memory_space<vmem>>, %arg5: memref<8x64xf32, #tpu.memory_space<vmem>>) attributes {dimension_semantics = [#tpu.dimension_semantics<parallel>, #tpu.dimension_semantics<parallel>], iteration_bounds = array<i64: 1, 1>, scalar_prefetch = 0 : i64, scratch_operands = 0 : i64, tpu.core_type = #tpu.core_type<tc>, window_params = [{transform_indices = @transform_0, window_bounds = array<i64: 8, 32>}, {transform_indices = @transform_1, window_bounds = array<i64: 32, 64>}, {transform_indices = @transform_2, window_bounds = array<i64: 1, 64>}, {transform_indices = @transform_3, window_bounds = array<i64: 8, 64>}]} {
    %c0 = arith.constant 0 : index
    %c0_0 = arith.constant 0 : index
    %0 = vector.load %arg2[%c0, %c0_0] : memref<8x32xf32, #tpu.memory_space<vmem>>, vector<8x32xf32>
    %1 = arith.negf %0 : vector<8x32xf32>
    %2 = math.exp %1 : vector<8x32xf32>
    %cst = arith.constant 1.000000e+00 : f32
    %3 = vector.broadcast %cst : f32 to vector<8x32xf32>
    %4 = arith.addf %3, %2 : vector<8x32xf32>
    %5 = arith.divf %3, %4 : vector<8x32xf32>
    %6 = arith.mulf %0, %5 : vector<8x32xf32>
    %c0_1 = arith.constant 0 : index
    %c0_2 = arith.constant 0 : index
    %7 = vector.load %arg3[%c0_1, %c0_2] : memref<32x64xf32, #tpu.memory_space<vmem>>, vector<32x64xf32>
    %cst_3 = arith.constant dense<0.000000e+00> : vector<8x64xf32>
    %8 = tpu.matmul %6, %7, %cst_3 {dimension_numbers = #tpu.dot_dimension_numbers<[1], [0], [0], [1], [0, 0, 1, 1], [], []>} : vector<8x32xf32>, vector<32x64xf32>, vector<8x64xf32> -> vector<8x64xf32>
    %c0_4 = arith.constant 0 : index
    %c0_5 = arith.constant 0 : index
    %9 = vector.load %arg4[%c0_4, %c0_5] : memref<1x64xf32, #tpu.memory_space<vmem>>, vector<1x64xf32>
    %10 = vector.broadcast %9 : vector<1x64xf32> to vector<8x64xf32>
    %11 = arith.addf %8, %10 : vector<8x64xf32>
    %c0_6 = arith.constant 0 : index
    %c0_7 = arith.constant 0 : index
    %12 = vector.load %arg5[%c0_6, %c0_7] : memref<8x64xf32, #tpu.memory_space<vmem>>, vector<8x64xf32>
    tpu.vector_store %arg5[%c0_6, %c0_7], %11 {strides = array<i32>} : memref<8x64xf32, #tpu.memory_space<vmem>>, vector<8x64xf32>,
    return
  }
  func.func @transform_0(%arg0: i32, %arg1: i32) -> (i32, i32) {
    %c0_i32 = arith.constant 0 : i32
    %c0_i32_0 = arith.constant 0 : i32
    return %arg0, %c0_i32 : i32, i32
  }
  func.func @transform_1(%arg0: i32, %arg1: i32) -> (i32, i32) {
    %c0_i32 = arith.constant 0 : i32
    %c0_i32_0 = arith.constant 0 : i32
    return %c0_i32, %arg1 : i32, i32
  }
  func.func @transform_2(%arg0: i32, %arg1: i32) -> (i32, i32) {
    %c0_i32 = arith.constant 0 : i32
    %c0_i32_0 = arith.constant 0 : i32
    return %c0_i32, %arg1 : i32, i32
  }
  func.func @transform_3(%arg0: i32, %arg1: i32) -> (i32, i32) {
    %c0_i32 = arith.constant 0 : i32
    return %arg0, %arg1 : i32, i32
  }
}

</mosaic_0001>

<bundles_post_ra>
// kernel: time_emb_forward.1
= control target key start
LH: loop header
LB: loop body
LE: loop exit
PB: predicated region body
PF: predicated region fallthrough
CT: control target
= control target key end

     0   :  { %8 = vsyncpa [#allocation3], 0  ;;  %s245_s0 = inlined_call_operand.hbm [shape: f32[8,32], index: 0, kind: input, shape index: {}]   ;;  %s246_s1 = inlined_call_operand.hbm [shape: f32[32,64], index: 1, kind: input, shape index: {}]   ;;  %s247_s2 = inlined_call_operand.vmem [shape: f32[1,64], index: 2, kind: input, shape index: {}]   ;;  %s248_s3 = inlined_call_operand.hbm [shape: f32[8,64], index: 3, kind: output, shape index: {}]  }
   0x1   :  { %9 = vsyncpa [#allocation6], 0 }
   0x2   :  { %10 = vsyncpa [#allocation4], 0  ;;  %s16_s14 = sshll.u32 %s245_s0, 4  ;;  %s208_s15 = smov [#allocation2]   ;;  %s17_s14 = int_to_ptr.hbm [resolvable:$true] %s16_s14 }
   0x3   :  { %s18_s16 = sshll.u32 %s208_s15, 4  ;;  %s26_s19 = sshll.u32 %s246_s1, 4  ;;  %s19_s16 = int_to_ptr.vmem [resolvable:$true] %s18_s16  ;;  %s27_s19 = int_to_ptr.hbm [resolvable:$true] %s26_s19 }
   0x4   :  { %21 = dma.hbm_to_vmem [thread:$0]  %s17_s14, 128, %s19_s16, [#allocation3]  }
   0x5   :  { %s209_s20 = smov [#allocation5]   ;;  %s210_s22 = smov 128  }
   0x6   :  { %s28_s21 = sshll.u32 %s209_s20, 4  ;;  %s211_s23 = smov 8   ;;  %s29_s21 = int_to_ptr.vmem [resolvable:$true] %s28_s21 }
   0x7   :  { %34 = dma.hbm_to_vmem [thread:$0]  %s27_s19, 512, %s29_s21, [#allocation6], %s210_s22, %s210_s22, %s211_s23  }
   0x8   :  { %202 = dma.done.wait [#allocation3], 128  }
   0x9   :  { %203 = vsyncadd [#allocation3], 4294967168 }
   0xa   :  { %204 = dma.done.wait [#allocation6], 512  }
   0xb   :  { %205 = vsyncadd [#allocation6], 4294966784  ;;  %v69_v0 = vld [vmem:[#allocation5 + $0x18] sm:$0xff]  ;;  %v68_v1 = vld [vmem:[#allocation5 + $0x10] sm:$0xff]  ;;  %vm74_vm4 = vcmask 261120   ;;  %s212_s24 = smov [#allocation7]  }
   0xc   :  { %90 = vmatpush.msra.mxu0 %v69_v0  ;;  %v45_v2 = vld [vmem:[#allocation2] sm:$0xff]  ;;  %v67_v3 = vld [vmem:[#allocation5 + $0x8] sm:$0xff]  ;;  %v66_v5 = vld [vmem:[#allocation5] sm:$0xff]  ;;  %s105_s25 = sshll.u32 %s212_s24, 4  ;;  %s107_s28 = sshll.u32 %s248_s3, 4  ;;  %vm98_vm5 = vcmask 523264   ;;  %s106_s25 = int_to_ptr.vmem [resolvable:$true] %s105_s25  ;;  %s108_s28 = int_to_ptr.hbm [resolvable:$true] %s107_s28 }
   0xd   :  { %v118_v4 = vmul.f32 -1.442695, %v45_v2  ;;  %v125_v19 = vld [vmem:[%s247_s2] ss:$0 sm:$0xff] }
   0xe   :  { %91 = vmatpush.msra.mxu0 %v68_v1 }
   0xf   :  { %126 = vpow2.f32 %v118_v4 }
  0x10   :  { %92 = vmatpush.msra.mxu0 %v67_v3 }
  0x12   :  { %93 = vmatpush.msra.mxu0 %v66_v5 }
  0x15   :  { %v127_v6 = vpop.eup %126 }
  0x16   :  { %v49_v7 = vadd.f32 1.0, %v127_v6 }
  0x18   :  { %128 = vrcp.f32 %v49_v7  ;;  %v61_v10 = vand.u32 2147483648, %v49_v7  ;;  %vm55_vm0 = vweird.f32 %v49_v7  ;;  %v59_v12 = vand.u32 2147483647, %v49_v7 }
  0x1a   :  { %v62_v14 = vor.u32 1.1754944e-38, %v61_v10  ;;  %vm60_vm3 = vcmp.eq.f32.partialorder %v59_v12, 8.507059e+37 }
  0x1e   :  { %v129_v8 = vpop.eup %128 }
  0x1f   :  { %v51_v9 = vmul.f32 %v129_v8, %v49_v7  ;;  %vm56_vm1 = vweird.f32 %v129_v8 }
  0x20   :  { %vm57_vm2 = vmor %vm55_vm0, %vm56_vm1 }
  0x21   :  { %v52_v11 = vsub.f32 1.0, %v51_v9 }
  0x23   :  { %v53_v13 = vmul.f32 %v129_v8, %v52_v11 }
  0x25   :  { %v54_v15 = vadd.f32 %v129_v8, %v53_v13 }
  0x27   :  { %v58_v16 = vsel %vm57_vm2, %v129_v8, %v54_v15 }
  0x28   :  { %v63_v17 = vsel %vm60_vm3, %v62_v14, %v58_v16 }
  0x29   :  { %v65_v18 = vmul.f32 %v63_v17, %v45_v2 }
  0x2b   :  { %119 = vmatmul.msk.f32.vlgmr.msra.gmra.mxu0 %vm74_vm4, %v65_v18 }
  0xa8   :  { %v95_v20 = vpop.f32.mrf.mxu0 }
  0xa9   :  { %v96_v21 = vadd.f32 %v125_v19, %v95_v20 }
  0xab   :  { %99 = vst.msk [vmem:[#allocation7] sm:$0xff] %vm98_vm5, %v96_v21 }
  0xac   :  { %110 = dma.vmem_to_hbm [thread:$0]  %s106_s25, 128, %s108_s28, [#allocation4]  }
  0xad   :  { %206 = dma.done.wait [#allocation4], 128  }
  0xae   :  { %207 = vsyncadd [#allocation4], 4294967168 }
  0xaf   :  { %115 = vsyncpa [#allocation3], 1 }
  0xb0   :  { %116 = vsyncpa [#allocation6], 1 }
  0xb1   :  { %117 = vsyncpa [#allocation4], 1 }

</bundles_post_ra>
